<compile_context>
chip_gen: v6e
topology: v6e:2x2x1
jax: 0.10.0
libtpu: 0.0.40
codegen_flags: <defaults>
</compile_context>

<pallas_src>
import math

import jax
import jax.numpy as jnp
import numpy as np
from jax import lax
from jax.experimental import pallas as pl
from jax.experimental.pallas import tpu as pltpu  # noqa: F401  (TPU backend)

DIM_EMB = 32
DIM_HEAD = 8
HEAD_NUM = 4
DIM_MID = DIM_HEAD * HEAD_NUM        # 32
DIM_HIDDEN = 4 * DIM_EMB             # 128
LANE = 128                           # TPU lane width; blocks padded to it
EPS = 1e-5
SCALE = 1.0 / math.sqrt(DIM_HEAD)

assert DIM_HIDDEN <= LANE and 3 * DIM_MID <= LANE, "packing assumes <=128 wide"


# --------------------------------- kernel -----------------------------------
def _decoder_kernel(x_ref, wa_ref, wf13_ref, wf2_ref, b_ref,
                    hmq_ref, hmo_ref, sb_ref, o_ref):
    """x_ref  : (B*S, 128) f32, cols DIM_EMB:128 exactly zero.
       wa_ref : (128, 128) bf16 attention weight bands.
       wf13_ref: (32, 256) bf16 [W1 | W3].
       wf2_ref : (128, 128) bf16 W2 (cols DIM_EMB:128 zero).
       b_ref  : (8, 128) f32 bias / RMSNorm-gain rows.
       hmq_ref: (H*BS, 32) f32: 1/sqrt(dh) on own-head lanes, 0 elsewhere.
       hmo_ref: (H*BS, 32) f32: 1.0 on own-head lanes, 0 elsewhere.
       sb_ref : (H*BS, BS) f32: 0 same-batch, -1e30 cross-batch."""
    f32 = jnp.float32
    x = x_ref[...]
    wa = wa_ref[...].astype(f32)
    w13 = wf13_ref[...].astype(f32)
    w2 = wf2_ref[...].astype(f32)
    b = b_ref[...]
    hm_q = hmq_ref[...]
    hm_o = hmo_ref[...]
    sb = sb_ref[...]

    bs = x.shape[0]

    def rms_norm(v, g):
        # Padded columns are exactly zero, so sum over 128 == sum over DIM_EMB.
        ms = jnp.sum(v * v, axis=-1, keepdims=True) * (1.0 / DIM_EMB)
        return g * (v * lax.rsqrt(ms + EPS))

    def attention(xin, wqkv, wo, bqkv, bo):
        # Fused QKV projection: (bs,32) @ (32,128); cols 0:96 valid.
        qkv = jnp.dot(xin[:, :DIM_EMB], wqkv,
                      preferred_element_type=f32) + bqkv            # (bs,128)
        q = qkv[:, 0:DIM_MID]
        k = qkv[:, DIM_MID:2 * DIM_MID]
        v = qkv[:, 2 * DIM_MID:3 * DIM_MID]
        # Stack the 4 heads along the sublane axis; hm_q folds in the
        # 1/sqrt(dim_head) scale and zeroes the other heads' lanes.
        q_s = jnp.concatenate([q] * HEAD_NUM, axis=0) * hm_q        # (H*bs,32)
        s = lax.dot_general(q_s, k, (((1,), (1,)), ((), ())),
                            preferred_element_type=f32)             # (H*bs,bs)
        s = s + sb                                                   # batch mask
        s = s - jnp.max(s, axis=-1, keepdims=True)
        p = jnp.exp(s)
        p = p * pl.reciprocal(jnp.sum(p, axis=-1, keepdims=True), approx=True)
        of = jnp.dot(p, v, preferred_element_type=f32) * hm_o       # (H*bs,32)
        # Collapse the sublane-stacked heads back to (bs, DIM_MID): each lane
        # group only has its own head's contribution left after masking.
        hcat = of[0:bs]
        for h in range(1, HEAD_NUM):                                 # static
            hcat = hcat + of[h * bs:(h + 1) * bs]
        # Output projection; wo cols DIM_EMB:128 are zero -> padding preserved.
        return jnp.dot(hcat, wo, preferred_element_type=f32) + bo   # (bs,128)

    # masked multi-head self-attention (mask=None path) + RMSNorm
    d0 = attention(x, wa[0:DIM_EMB, :], wa[2 * DIM_EMB:3 * DIM_EMB, :],
                   b[0:1, :], b[1:2, :])
    d1 = rms_norm(x + d0, b[4:5, :])

    # cross attention (enc_k / enc_v default to d1) + RMSNorm
    d2 = attention(d1, wa[DIM_EMB:2 * DIM_EMB, :], wa[3 * DIM_EMB:4 * DIM_EMB, :],
                   b[2:3, :], b[3:4, :])
    d3 = rms_norm(d1 + d2, b[5:6, :])

    # SwiGLU feed-forward: fused W1|W3 up-projection, then w2(silu(h1)*h3)
    h13 = jnp.dot(d3[:, :DIM_EMB], w13, preferred_element_type=f32)  # (bs,256)
    h1 = h13[:, :DIM_HIDDEN]
    h3 = h13[:, DIM_HIDDEN:]
    gate = h1 * jax.nn.sigmoid(h1) * h3
    d4 = jnp.dot(gate, w2, preferred_element_type=f32)               # (bs,128)
    o_ref[...] = rms_norm(d3 + d4, b[6:7, :])


# --------------------------- one-time packing --------------------------------
def pack_decoder_params(params, batch, seq_len):
    """Runs ONCE at model init (pure numpy): builds the co-packed bf16 weight
    slabs, the f32 bias/gain rows, and the constant attention masks."""
    p = [np.asarray(a, np.float32) for a in params]
    (wq1, bq1, wk1, bk1, wv1, bv1, wo1, bo1, g1,
     wq2, bq2, wk2, bk2, wv2, bv2, wo2, bo2, g2,
     w1, w3, w2, g3) = p

    w_attn = np.zeros((LANE, LANE), np.float32)
    w_attn[0:DIM_EMB, 0:3 * DIM_MID] = np.concatenate([wq1, wk1, wv1], axis=1)
    w_attn[DIM_EMB:2 * DIM_EMB, 0:3 * DIM_MID] = np.concatenate([wq2, wk2, wv2], axis=1)
    w_attn[2 * DIM_EMB:3 * DIM_EMB, 0:DIM_EMB] = wo1
    w_attn[3 * DIM_EMB:4 * DIM_EMB, 0:DIM_EMB] = wo2

    w_ffn13 = np.concatenate([w1, w3], axis=1)                  # (32, 256)

    w_ffn2 = np.zeros((DIM_HIDDEN, LANE), np.float32)
    w_ffn2[:, 0:DIM_EMB] = w2                                   # (128, 128)

    brows = np.zeros((8, LANE), np.float32)
    brows[0, 0:3 * DIM_MID] = np.concatenate([bq1, bk1, bv1], axis=1)[0]
    brows[1, 0:DIM_EMB] = bo1[0]
    brows[2, 0:3 * DIM_MID] = np.concatenate([bq2, bk2, bv2], axis=1)[0]
    brows[3, 0:DIM_EMB] = bo2[0]
    brows[4, 0:DIM_EMB] = g1[0]
    brows[5, 0:DIM_EMB] = g2[0]
    brows[6, 0:DIM_EMB] = g3[0]

    bs = batch * seq_len
    assert bs % 8 == 0, "B*S must be a multiple of 8 (sublane tiling)"
    rows = np.arange(HEAD_NUM * bs)
    head_of_row = rows // bs
    head_of_col = np.arange(DIM_MID) // DIM_HEAD
    hm_o = (head_of_row[:, None] == head_of_col[None, :]).astype(np.float32)
    hm_q = hm_o * SCALE                                          # scale folded in
    tok = rows % bs
    sb = np.where((tok[:, None] // seq_len) == (np.arange(bs)[None, :] // seq_len),
                  0.0, -1e30).astype(np.float32)                 # (H*bs, bs)

    return (jnp.asarray(w_attn, jnp.bfloat16),
            jnp.asarray(w_ffn13, jnp.bfloat16),
            jnp.asarray(w_ffn2, jnp.bfloat16),
            jnp.asarray(brows, jnp.float32),
            jnp.asarray(hm_q, jnp.float32),
            jnp.asarray(hm_o, jnp.float32),
            jnp.asarray(sb, jnp.float32))


# -------------------------------- wrapper ------------------------------------
@jax.jit
def decoder_forward(x, packed):
    B, S, D = x.shape
    bs = B * S
    w_attn, w_ffn13, w_ffn2, brows, hm_q, hm_o, sb = packed

    # Lane-dense, flattened activations: (B*S, 32) -> (B*S, 128), zero padded.
    x_pad = jnp.pad(x.reshape(bs, D), ((0, 0), (0, LANE - D)))

    attn_flops = (2 * bs * DIM_EMB * LANE                 # fused qkv projection
                  + 2 * HEAD_NUM * bs * DIM_MID * bs      # fused score matmul
                  + 2 * HEAD_NUM * bs * bs * DIM_MID      # fused PV matmul
                  + 2 * bs * DIM_MID * LANE)              # output projection
    ffn_flops = 2 * bs * DIM_EMB * (2 * DIM_HIDDEN) + 2 * bs * DIM_HIDDEN * LANE
    flops = 2 * attn_flops + ffn_flops
    transcendentals = 2 * HEAD_NUM * bs * bs + bs * DIM_HIDDEN + 3 * bs
    bytes_accessed = (x_pad.size * 4
                      + sum(int(a.size) * a.dtype.itemsize for a in packed)
                      + bs * LANE * 4)

    out = pl.pallas_call(
        _decoder_kernel,
        out_shape=jax.ShapeDtypeStruct((bs, LANE), jnp.float32),
        cost_estimate=pl.CostEstimate(flops=flops,
                                      transcendentals=transcendentals,
                                      bytes_accessed=bytes_accessed),
    )(x_pad, w_attn, w_ffn13, w_ffn2, brows, hm_q, hm_o, sb)

    return out[:, :D].reshape(B, S, D)


# ----------------------------- pure-JAX reference ----------------------------
def _ref_mha(xq, xk, xv, wq, bq, wk, bk, wv, bv, wo, bo):
    B, Sq, _ = xq.shape
    Skv = xk.shape[1]
    q = (xq @ wq + bq).reshape(B, Sq, HEAD_NUM, DIM_HEAD).transpose(0, 2, 1, 3)
    k = (xk @ wk + bk).reshape(B, Skv, HEAD_NUM, DIM_HEAD).transpose(0, 2, 1, 3)
    v = (xv @ wv + bv).reshape(B, Skv, HEAD_NUM, DIM_HEAD).transpose(0, 2, 1, 3)
    s = jnp.einsum('bhqd,bhkd->bhqk', q, k) / math.sqrt(DIM_HEAD)
    p = jax.nn.softmax(s, axis=-1)
    o = jnp.einsum('bhqk,bhkd->bhqd', p, v)
    o = o.transpose(0, 2, 1, 3).reshape(B, Sq, DIM_MID)
    return o @ wo + bo


def _ref_rms(x, g):
    ms = jnp.mean(x * x, axis=-1, keepdims=True)
    return g * (x * jax.lax.rsqrt(ms + EPS))


def decoder_reference(x, params):
    (wq1, bq1, wk1, bk1, wv1, bv1, wo1, bo1, g1,
     wq2, bq2, wk2, bk2, wv2, bv2, wo2, bo2, g2,
     w1, w3, w2, g3) = params
    d0 = _ref_mha(x, x, x, wq1, bq1, wk1, bk1, wv1, bv1, wo1, bo1)
    d1 = _ref_rms(x + d0, g1)
    d2 = _ref_mha(d1, d1, d1, wq2, bq2, wk2, bk2, wv2, bv2, wo2, bo2)
    d3 = _ref_rms(d1 + d2, g2)
    h1 = d3 @ w1
    h3 = d3 @ w3
    d4 = ((h1 * jax.nn.sigmoid(h1)) * h3) @ w2
    return _ref_rms(d3 + d4, g3)


# ----------------------------------- main ------------------------------------
def _make_params(key):
    ks = jax.random.split(key, 16)

    def _bf16(w):
        # Weights are stored as bf16 in the packed slab; generate them
        # bf16-representable so kernel (bf16 slab -> f32 compute) and the
        # f32 reference use bit-identical effective weights.
        return jnp.asarray(w, jnp.bfloat16).astype(jnp.float32)

    def lin(k, din, dout):
        return _bf16(0.05 * jax.random.normal(k, (din, dout), jnp.float32))

    def bias(k, d):
        return 0.05 * jax.random.normal(k, (1, d), jnp.float32)

    ones_d = jnp.ones((1, DIM_EMB), jnp.float32)
    params = [
        # masked multi-head self-attention
        lin(ks[0], DIM_EMB, DIM_MID), bias(ks[1], DIM_MID),
        lin(ks[2], DIM_EMB, DIM_MID), bias(ks[3], DIM_MID),
        lin(ks[4], DIM_EMB, DIM_MID), bias(ks[5], DIM_MID),
        lin(ks[6], DIM_MID, DIM_EMB), bias(ks[7], DIM_EMB),
        ones_d,                                        # rms_norm1 weight
        # cross multi-head attention
        lin(ks[8], DIM_EMB, DIM_MID), bias(ks[9], DIM_MID),
        lin(ks[10], DIM_EMB, DIM_MID), bias(ks[11], DIM_MID),
        lin(ks[12], DIM_EMB, DIM_MID), bias(ks[13], DIM_MID),
        lin(ks[14], DIM_MID, DIM_EMB), bias(ks[15], DIM_EMB),
        ones_d,                                        # rms_norm2 weight
        # feed-forward (bias=False)
        lin(jax.random.PRNGKey(101), DIM_EMB, DIM_HIDDEN),   # w1
        lin(jax.random.PRNGKey(102), DIM_EMB, DIM_HIDDEN),   # w3
        lin(jax.random.PRNGKey(103), DIM_HIDDEN, DIM_EMB),   # w2
        ones_d,                                        # rms_norm3 weight
    ]
    return params


if __name__ == "__main__":
    B, S = 2, 8
    key = jax.random.PRNGKey(0)
    k_x, k_p = jax.random.split(key)
    x = jax.random.normal(k_x, (B, S, DIM_EMB), jnp.float32)
    params = _make_params(k_p)

    # One-time packing, OUTSIDE the per-call jitted path.
    packed = pack_decoder_params(params, B, S)

    out = decoder_forward(x, packed)
    out = jax.block_until_ready(out)

    ref = decoder_reference(x, params)
    # slightly relaxed tolerance: softmax uses the approx (EUP) reciprocal
    np.testing.assert_allclose(np.asarray(out), np.asarray(ref),
                               rtol=2e-3, atol=2e-3)
    print("KERNEL_OK")
</pallas_src>

<mosaic_0001>
module attributes {stable_mosaic.version = 11 : i64} {
  func.func @_decoder_kernel(%arg0: memref<16x128xf32, #tpu.memory_space<vmem>>, %arg1: memref<128x128xbf16, #tpu.memory_space<vmem>>, %arg2: memref<32x256xbf16, #tpu.memory_space<vmem>>, %arg3: memref<128x128xbf16, #tpu.memory_space<vmem>>, %arg4: memref<8x128xf32, #tpu.memory_space<vmem>>, %arg5: memref<64x32xf32, #tpu.memory_space<vmem>>, %arg6: memref<64x32xf32, #tpu.memory_space<vmem>>, %arg7: memref<64x16xf32, #tpu.memory_space<vmem>>, %arg8: memref<16x128xf32, #tpu.memory_space<vmem>>) attributes {dimension_semantics = [], scalar_prefetch = 0 : i64, scratch_operands = 0 : i64, tpu.core_type = #tpu.core_type<tc>} {
    %c0 = arith.constant 0 : index
    %c0_0 = arith.constant 0 : index
    %0 = vector.load %arg0[%c0, %c0_0] : memref<16x128xf32, #tpu.memory_space<vmem>>, vector<16x128xf32>
    %c0_1 = arith.constant 0 : index
    %c0_2 = arith.constant 0 : index
    %1 = vector.load %arg1[%c0_1, %c0_2] : memref<128x128xbf16, #tpu.memory_space<vmem>>, vector<128x128xbf16>
    %2 = arith.extf %1 : vector<128x128xbf16> to vector<128x128xf32>
    %c0_3 = arith.constant 0 : index
    %c0_4 = arith.constant 0 : index
    %3 = vector.load %arg2[%c0_3, %c0_4] : memref<32x256xbf16, #tpu.memory_space<vmem>>, vector<32x256xbf16>
    %4 = arith.extf %3 : vector<32x256xbf16> to vector<32x256xf32>
    %c0_5 = arith.constant 0 : index
    %c0_6 = arith.constant 0 : index
    %5 = vector.load %arg3[%c0_5, %c0_6] : memref<128x128xbf16, #tpu.memory_space<vmem>>, vector<128x128xbf16>
    %6 = arith.extf %5 : vector<128x128xbf16> to vector<128x128xf32>
    %c0_7 = arith.constant 0 : index
    %c0_8 = arith.constant 0 : index
    %7 = vector.load %arg4[%c0_7, %c0_8] : memref<8x128xf32, #tpu.memory_space<vmem>>, vector<8x128xf32>
    %c0_9 = arith.constant 0 : index
    %c0_10 = arith.constant 0 : index
    %8 = vector.load %arg5[%c0_9, %c0_10] : memref<64x32xf32, #tpu.memory_space<vmem>>, vector<64x32xf32>
    %c0_11 = arith.constant 0 : index
    %c0_12 = arith.constant 0 : index
    %9 = vector.load %arg6[%c0_11, %c0_12] : memref<64x32xf32, #tpu.memory_space<vmem>>, vector<64x32xf32>
    %c0_13 = arith.constant 0 : index
    %c0_14 = arith.constant 0 : index
    %10 = vector.load %arg7[%c0_13, %c0_14] : memref<64x16xf32, #tpu.memory_space<vmem>>, vector<64x16xf32>
    %11 = vector.extract_strided_slice %2 {offsets = [0, 0], sizes = [32, 128], strides = [1, 1]} : vector<128x128xf32> to vector<32x128xf32>
    %12 = vector.extract_strided_slice %2 {offsets = [64, 0], sizes = [32, 128], strides = [1, 1]} : vector<128x128xf32> to vector<32x128xf32>
    %13 = vector.extract_strided_slice %7 {offsets = [0, 0], sizes = [1, 128], strides = [1, 1]} : vector<8x128xf32> to vector<1x128xf32>
    %14 = vector.extract_strided_slice %7 {offsets = [1, 0], sizes = [1, 128], strides = [1, 1]} : vector<8x128xf32> to vector<1x128xf32>
    %15 = vector.extract_strided_slice %0 {offsets = [0, 0], sizes = [16, 32], strides = [1, 1]} : vector<16x128xf32> to vector<16x32xf32>
    %cst = arith.constant dense<0.000000e+00> : vector<16x128xf32>
    %16 = tpu.matmul %15, %11, %cst {dimension_numbers = #tpu.dot_dimension_numbers<[1], [0], [0], [1], [0, 0, 1, 1], [], []>} : vector<16x32xf32>, vector<32x128xf32>, vector<16x128xf32> -> vector<16x128xf32>
    %17 = vector.broadcast %13 : vector<1x128xf32> to vector<16x128xf32>
    %18 = arith.addf %16, %17 : vector<16x128xf32>
    %19 = vector.extract_strided_slice %18 {offsets = [0, 0], sizes = [16, 32], strides = [1, 1]} : vector<16x128xf32> to vector<16x32xf32>
    %20 = vector.extract_strided_slice %18 {offsets = [0, 32], sizes = [16, 32], strides = [1, 1]} : vector<16x128xf32> to vector<16x32xf32>
    %21 = vector.extract_strided_slice %18 {offsets = [0, 64], sizes = [16, 32], strides = [1, 1]} : vector<16x128xf32> to vector<16x32xf32>
    %22 = tpu.concatenate %19, %19, %19, %19 in 0 : vector<16x32xf32>, vector<16x32xf32>, vector<16x32xf32>, vector<16x32xf32> -> vector<64x32xf32>
    %23 = arith.mulf %22, %8 : vector<64x32xf32>
    %cst_15 = arith.constant dense<0.000000e+00> : vector<64x16xf32>
    %24 = tpu.matmul %23, %20, %cst_15 {dimension_numbers = #tpu.dot_dimension_numbers<[1], [1], [0], [0], [0, 0, 1, 0], [], []>} : vector<64x32xf32>, vector<16x32xf32>, vector<64x16xf32> -> vector<64x16xf32>
    %25 = arith.addf %24, %10 : vector<64x16xf32>
    %cst_16 = arith.constant dense<0xFF800000> : vector<64xf32>
    %26 = vector.multi_reduction <maximumf>, %25, %cst_16 [1] : vector<64x16xf32> to vector<64xf32>
    %27 = vector.shape_cast %26 : vector<64xf32> to vector<64x1xf32>
    %28 = vector.broadcast %27 : vector<64x1xf32> to vector<64x16xf32>
    %29 = arith.subf %25, %28 : vector<64x16xf32>
    %30 = math.exp %29 : vector<64x16xf32>
    %cst_17 = arith.constant dense<0.000000e+00> : vector<64xf32>
    %31 = vector.multi_reduction <add>, %30, %cst_17 [1] : vector<64x16xf32> to vector<64xf32>
    %32 = vector.shape_cast %31 : vector<64xf32> to vector<64x1xf32>
    %33 = tpu.reciprocal %32 {approx = true} : vector<64x1xf32> -> vector<64x1xf32>
    %34 = vector.broadcast %33 : vector<64x1xf32> to vector<64x16xf32>
    %35 = arith.mulf %30, %34 : vector<64x16xf32>
    %cst_18 = arith.constant dense<0.000000e+00> : vector<64x32xf32>
    %36 = tpu.matmul %35, %21, %cst_18 {dimension_numbers = #tpu.dot_dimension_numbers<[1], [0], [0], [1], [0, 0, 1, 1], [], []>} : vector<64x16xf32>, vector<16x32xf32>, vector<64x32xf32> -> vector<64x32xf32>
    %37 = arith.mulf %36, %9 : vector<64x32xf32>
    %38 = vector.extract_strided_slice %37 {offsets = [0, 0], sizes = [16, 32], strides = [1, 1]} : vector<64x32xf32> to vector<16x32xf32>
    %39 = vector.extract_strided_slice %37 {offsets = [16, 0], sizes = [16, 32], strides = [1, 1]} : vector<64x32xf32> to vector<16x32xf32>
    %40 = arith.addf %38, %39 : vector<16x32xf32>
    %41 = vector.extract_strided_slice %37 {offsets = [32, 0], sizes = [16, 32], strides = [1, 1]} : vector<64x32xf32> to vector<16x32xf32>
    %42 = arith.addf %40, %41 : vector<16x32xf32>
    %43 = vector.extract_strided_slice %37 {offsets = [48, 0], sizes = [16, 32], strides = [1, 1]} : vector<64x32xf32> to vector<16x32xf32>
    %44 = arith.addf %42, %43 : vector<16x32xf32>
    %cst_19 = arith.constant dense<0.000000e+00> : vector<16x128xf32>
    %45 = tpu.matmul %44, %12, %cst_19 {dimension_numbers = #tpu.dot_dimension_numbers<[1], [0], [0], [1], [0, 0, 1, 1], [], []>} : vector<16x32xf32>, vector<32x128xf32>, vector<16x128xf32> -> vector<16x128xf32>
    %46 = vector.broadcast %14 : vector<1x128xf32> to vector<16x128xf32>
    %47 = arith.addf %45, %46 : vector<16x128xf32>
    %48 = arith.addf %0, %47 : vector<16x128xf32>
    %49 = vector.extract_strided_slice %7 {offsets = [4, 0], sizes = [1, 128], strides = [1, 1]} : vector<8x128xf32> to vector<1x128xf32>
    %50 = arith.mulf %48, %48 : vector<16x128xf32>
    %cst_20 = arith.constant dense<0.000000e+00> : vector<16xf32>
    %51 = vector.multi_reduction <add>, %50, %cst_20 [1] : vector<16x128xf32> to vector<16xf32>
    %52 = vector.shape_cast %51 : vector<16xf32> to vector<16x1xf32>
    %cst_21 = arith.constant 3.125000e-02 : f32
    %53 = vector.broadcast %cst_21 : f32 to vector<16x1xf32>
    %54 = arith.mulf %52, %53 : vector<16x1xf32>
    %cst_22 = arith.constant 9.99999974E-6 : f32
    %55 = vector.broadcast %cst_22 : f32 to vector<16x1xf32>
    %56 = arith.addf %54, %55 : vector<16x1xf32>
    %57 = math.rsqrt %56 : vector<16x1xf32>
    %58 = vector.broadcast %57 : vector<16x1xf32> to vector<16x128xf32>
    %59 = arith.mulf %48, %58 : vector<16x128xf32>
    %60 = vector.broadcast %49 : vector<1x128xf32> to vector<16x128xf32>
    %61 = arith.mulf %60, %59 : vector<16x128xf32>
    %62 = vector.extract_strided_slice %2 {offsets = [32, 0], sizes = [32, 128], strides = [1, 1]} : vector<128x128xf32> to vector<32x128xf32>
    %63 = vector.extract_strided_slice %2 {offsets = [96, 0], sizes = [32, 128], strides = [1, 1]} : vector<128x128xf32> to vector<32x128xf32>
    %64 = vector.extract_strided_slice %7 {offsets = [2, 0], sizes = [1, 128], strides = [1, 1]} : vector<8x128xf32> to vector<1x128xf32>
    %65 = vector.extract_strided_slice %7 {offsets = [3, 0], sizes = [1, 128], strides = [1, 1]} : vector<8x128xf32> to vector<1x128xf32>
    %66 = vector.extract_strided_slice %61 {offsets = [0, 0], sizes = [16, 32], strides = [1, 1]} : vector<16x128xf32> to vector<16x32xf32>
    %cst_23 = arith.constant dense<0.000000e+00> : vector<16x128xf32>
    %67 = tpu.matmul %66, %62, %cst_23 {dimension_numbers = #tpu.dot_dimension_numbers<[1], [0], [0], [1], [0, 0, 1, 1], [], []>} : vector<16x32xf32>, vector<32x128xf32>, vector<16x128xf32> -> vector<16x128xf32>
    %68 = vector.broadcast %64 : vector<1x128xf32> to vector<16x128xf32>
    %69 = arith.addf %67, %68 : vector<16x128xf32>
    %70 = vector.extract_strided_slice %69 {offsets = [0, 0], sizes = [16, 32], strides = [1, 1]} : vector<16x128xf32> to vector<16x32xf32>
    %71 = vector.extract_strided_slice %69 {offsets = [0, 32], sizes = [16, 32], strides = [1, 1]} : vector<16x128xf32> to vector<16x32xf32>
    %72 = vector.extract_strided_slice %69 {offsets = [0, 64], sizes = [16, 32], strides = [1, 1]} : vector<16x128xf32> to vector<16x32xf32>
    %73 = tpu.concatenate %70, %70, %70, %70 in 0 : vector<16x32xf32>, vector<16x32xf32>, vector<16x32xf32>, vector<16x32xf32> -> vector<64x32xf32>
    %74 = arith.mulf %73, %8 : vector<64x32xf32>
    %cst_24 = arith.constant dense<0.000000e+00> : vector<64x16xf32>
    %75 = tpu.matmul %74, %71, %cst_24 {dimension_numbers = #tpu.dot_dimension_numbers<[1], [1], [0], [0], [0, 0, 1, 0], [], []>} : vector<64x32xf32>, vector<16x32xf32>, vector<64x16xf32> -> vector<64x16xf32>
    %76 = arith.addf %75, %10 : vector<64x16xf32>
    %cst_25 = arith.constant dense<0xFF800000> : vector<64xf32>
    %77 = vector.multi_reduction <maximumf>, %76, %cst_25 [1] : vector<64x16xf32> to vector<64xf32>
    %78 = vector.shape_cast %77 : vector<64xf32> to vector<64x1xf32>
    %79 = vector.broadcast %78 : vector<64x1xf32> to vector<64x16xf32>
    %80 = arith.subf %76, %79 : vector<64x16xf32>
    %81 = math.exp %80 : vector<64x16xf32>
    %cst_26 = arith.constant dense<0.000000e+00> : vector<64xf32>
    %82 = vector.multi_reduction <add>, %81, %cst_26 [1] : vector<64x16xf32> to vector<64xf32>
    %83 = vector.shape_cast %82 : vector<64xf32> to vector<64x1xf32>
    %84 = tpu.reciprocal %83 {approx = true} : vector<64x1xf32> -> vector<64x1xf32>
    %85 = vector.broadcast %84 : vector<64x1xf32> to vector<64x16xf32>
    %86 = arith.mulf %81, %85 : vector<64x16xf32>
    %cst_27 = arith.constant dense<0.000000e+00> : vector<64x32xf32>
    %87 = tpu.matmul %86, %72, %cst_27 {dimension_numbers = #tpu.dot_dimension_numbers<[1], [0], [0], [1], [0, 0, 1, 1], [], []>} : vector<64x16xf32>, vector<16x32xf32>, vector<64x32xf32> -> vector<64x32xf32>
    %88 = arith.mulf %87, %9 : vector<64x32xf32>
    %89 = vector.extract_strided_slice %88 {offsets = [0, 0], sizes = [16, 32], strides = [1, 1]} : vector<64x32xf32> to vector<16x32xf32>
    %90 = vector.extract_strided_slice %88 {offsets = [16, 0], sizes = [16, 32], strides = [1, 1]} : vector<64x32xf32> to vector<16x32xf32>
    %91 = arith.addf %89, %90 : vector<16x32xf32>
    %92 = vector.extract_strided_slice %88 {offsets = [32, 0], sizes = [16, 32], strides = [1, 1]} : vector<64x32xf32> to vector<16x32xf32>
    %93 = arith.addf %91, %92 : vector<16x32xf32>
    %94 = vector.extract_strided_slice %88 {offsets = [48, 0], sizes = [16, 32], strides = [1, 1]} : vector<64x32xf32> to vector<16x32xf32>
    %95 = arith.addf %93, %94 : vector<16x32xf32>
    %cst_28 = arith.constant dense<0.000000e+00> : vector<16x128xf32>
    %96 = tpu.matmul %95, %63, %cst_28 {dimension_numbers = #tpu.dot_dimension_numbers<[1], [0], [0], [1], [0, 0, 1, 1], [], []>} : vector<16x32xf32>, vector<32x128xf32>, vector<16x128xf32> -> vector<16x128xf32>
    %97 = vector.broadcast %65 : vector<1x128xf32> to vector<16x128xf32>
    %98 = arith.addf %96, %97 : vector<16x128xf32>
    %99 = arith.addf %61, %98 : vector<16x128xf32>
    %100 = vector.extract_strided_slice %7 {offsets = [5, 0], sizes = [1, 128], strides = [1, 1]} : vector<8x128xf32> to vector<1x128xf32>
    %101 = arith.mulf %99, %99 : vector<16x128xf32>
    %cst_29 = arith.constant dense<0.000000e+00> : vector<16xf32>
    %102 = vector.multi_reduction <add>, %101, %cst_29 [1] : vector<16x128xf32> to vector<16xf32>
    %103 = vector.shape_cast %102 : vector<16xf32> to vector<16x1xf32>
    %cst_30 = arith.constant 3.125000e-02 : f32
    %104 = vector.broadcast %cst_30 : f32 to vector<16x1xf32>
    %105 = arith.mulf %103, %104 : vector<16x1xf32>
    %cst_31 = arith.constant 9.99999974E-6 : f32
    %106 = vector.broadcast %cst_31 : f32 to vector<16x1xf32>
    %107 = arith.addf %105, %106 : vector<16x1xf32>
    %108 = math.rsqrt %107 : vector<16x1xf32>
    %109 = vector.broadcast %108 : vector<16x1xf32> to vector<16x128xf32>
    %110 = arith.mulf %99, %109 : vector<16x128xf32>
    %111 = vector.broadcast %100 : vector<1x128xf32> to vector<16x128xf32>
    %112 = arith.mulf %111, %110 : vector<16x128xf32>
    %113 = vector.extract_strided_slice %112 {offsets = [0, 0], sizes = [16, 32], strides = [1, 1]} : vector<16x128xf32> to vector<16x32xf32>
    %cst_32 = arith.constant dense<0.000000e+00> : vector<16x256xf32>
    %114 = tpu.matmul %113, %4, %cst_32 {dimension_numbers = #tpu.dot_dimension_numbers<[1], [0], [0], [1], [0, 0, 1, 1], [], []>} : vector<16x32xf32>, vector<32x256xf32>, vector<16x256xf32> -> vector<16x256xf32>
    %115 = vector.extract_strided_slice %114 {offsets = [0, 0], sizes = [16, 128], strides = [1, 1]} : vector<16x256xf32> to vector<16x128xf32>
    %116 = vector.extract_strided_slice %114 {offsets = [0, 128], sizes = [16, 128], strides = [1, 1]} : vector<16x256xf32> to vector<16x128xf32>
    %117 = arith.negf %115 : vector<16x128xf32>
    %118 = math.exp %117 : vector<16x128xf32>
    %cst_33 = arith.constant 1.000000e+00 : f32
    %119 = vector.broadcast %cst_33 : f32 to vector<16x128xf32>
    %120 = arith.addf %119, %118 : vector<16x128xf32>
    %121 = arith.divf %119, %120 : vector<16x128xf32>
    %122 = arith.mulf %115, %121 : vector<16x128xf32>
    %123 = arith.mulf %122, %116 : vector<16x128xf32>
    %cst_34 = arith.constant dense<0.000000e+00> : vector<16x128xf32>
    %124 = tpu.matmul %123, %6, %cst_34 {dimension_numbers = #tpu.dot_dimension_numbers<[1], [0], [0], [1], [0, 0, 1, 1], [], []>} : vector<16x128xf32>, vector<128x128xf32>, vector<16x128xf32> -> vector<16x128xf32>
    %125 = arith.addf %112, %124 : vector<16x128xf32>
    %126 = vector.extract_strided_slice %7 {offsets = [6, 0], sizes = [1, 128], strides = [1, 1]} : vector<8x128xf32> to vector<1x128xf32>
    %127 = arith.mulf %125, %125 : vector<16x128xf32>
    %cst_35 = arith.constant dense<0.000000e+00> : vector<16xf32>
    %128 = vector.multi_reduction <add>, %127, %cst_35 [1] : vector<16x128xf32> to vector<16xf32>
    %129 = vector.shape_cast %128 : vector<16xf32> to vector<16x1xf32>
    %cst_36 = arith.constant 3.125000e-02 : f32
    %130 = vector.broadcast %cst_36 : f32 to vector<16x1xf32>
    %131 = arith.mulf %129, %130 : vector<16x1xf32>
    %cst_37 = arith.constant 9.99999974E-6 : f32
    %132 = vector.broadcast %cst_37 : f32 to vector<16x1xf32>
    %133 = arith.addf %131, %132 : vector<16x1xf32>
    %134 = math.rsqrt %133 : vector<16x1xf32>
    %135 = vector.broadcast %134 : vector<16x1xf32> to vector<16x128xf32>
    %136 = arith.mulf %125, %135 : vector<16x128xf32>
    %137 = vector.broadcast %126 : vector<1x128xf32> to vector<16x128xf32>
    %138 = arith.mulf %137, %136 : vector<16x128xf32>
    %c0_38 = arith.constant 0 : index
    %c0_39 = arith.constant 0 : index
    %139 = vector.load %arg8[%c0_38, %c0_39] : memref<16x128xf32, #tpu.memory_space<vmem>>, vector<16x128xf32>
    tpu.vector_store %arg8[%c0_38, %c0_39], %138 {strides = array<i32>} : memref<16x128xf32, #tpu.memory_space<vmem>>, vector<16x128xf32>,
    return
  }
}

</mosaic_0001>

<bundles_post_ra>
// kernel: decoder_forward.1
= control target key start
LH: loop header
LB: loop body
LE: loop exit
PB: predicated region body
PF: predicated region fallthrough
CT: control target
= control target key end

     0   :  { %vm136_vm0 = vcmask 261120   ;;  %v132_v8 = vlaneseq  ;;  %s1927_s16 = smov 96   ;;  %vm365_vm1 = vcmask 130048   ;;  %s2391_s1 = inlined_call_operand.vmem [shape: bf16[128,128], index: 1, kind: input, shape index: {}]   ;;  %s2392_s0 = inlined_call_operand.vmem [shape: f32[16,128], index: 0, kind: input, shape index: {}]   ;;  %s2393_s4 = inlined_call_operand.vmem [shape: f32[8,128], index: 4, kind: input, shape index: {}]   ;;  %s2394_s5 = inlined_call_operand.vmem [shape: f32[64,32], index: 5, kind: input, shape index: {}]   ;;  %s2395_s7 = inlined_call_operand.vmem [shape: f32[64,16], index: 7, kind: input, shape index: {}]   ;;  %s2396_s6 = inlined_call_operand.vmem [shape: f32[64,32], index: 6, kind: input, shape index: {}]   ;;  %s2397_s2 = inlined_call_operand.vmem [shape: bf16[32,256], index: 2, kind: input, shape index: {}]   ;;  %s2398_s3 = inlined_call_operand.vmem [shape: bf16[128,128], index: 3, kind: input, shape index: {}]   ;;  %s2399_s8 = inlined_call_operand.vmem [shape: f32[16,128], index: 8, kind: output, shape index: {}]  }
   0x1   :  { %v1600_v0 = vld [vmem:[%s2391_s1 + $0x8] sm:$0xff]   ;;  %v1537_v1 = vld [vmem:[%s2391_s1] sm:$0xff]   ;;  %v2031_v22 = vld [vmem:[%s2394_s5 + $0x10] sm:$0xff] }
   0x2   :  { %v1984_v2 = vld [vmem:[%s2392_s0] sm:$0xff]  ;;  %v1542_v3 = vunpack.c.l.bf16 %v1600_v0  ;;  %v1543_v4 = vunpack.c.h.bf16 %v1600_v0  ;;  %v1539_v5 = vunpack.c.h.bf16 %v1537_v1  ;;  %v1538_v6 = vunpack.c.l.bf16 %v1537_v1  ;;  %v1991_v7 = vld [vmem:[%s2392_s0 + $0x8] sm:$0xff]  ;;  %v2041_v25 = vld [vmem:[%s2394_s5 + $0x18] sm:$0xff] }
   0x3   :  { %1704 = vmatprep.mubr.msk.f32.mxu0 %vm136_vm0, %v1984_v2  ;;  %v1995_v9 = vshrl.u32 %v132_v8, 7  ;;  %v2001_v11 = vld [vmem:[%s2393_s4] sm:$0xff]  ;;  %v2025_v21 = vld [vmem:[%s2394_s5 + $0x8] sm:$0xff]  ;;  %v2063_v30 = vld [vmem:[%s2394_s5 + $0x30] sm:$0xff] }
   0x4   :  { %1696 = vmatprep.subr.mxu0 %v1543_v4  ;;  %v2009_v16 = vld [vmem:[%s2394_s5] sm:$0xff]  ;;  %v2057_v29 = vld [vmem:[%s2394_s5 + $0x28] sm:$0xff]  ;;  %v2073_v33 = vld [vmem:[%s2394_s5 + $0x38] sm:$0xff] }
   0x5   :  { %1697 = vmatpush3.msra.mxu0 %v1543_v4  ;;  %v134_v10 = vsub.s32 0, %v1995_v9  ;;  %v2047_v26 = vld [vmem:[%s2394_s5 + $0x20] sm:$0xff]  ;;  %v2083_v35 = vld [vmem:[%s2395_s7 + $0x8] sm:$0xff]  ;;  %v2096_v42 = vld [vmem:[%s2395_s7 + $0x18] sm:$0xff] }
   0x6   :  { %1698 = vmatprep.subr.mxu0 %v1542_v3  ;;  %v2088_v37 = vld [vmem:[%s2395_s7] sm:$0xff]  ;;  %v2101_v44 = vld [vmem:[%s2395_s7 + $0x10] sm:$0xff]  ;;  %v2109_v49 = vld [vmem:[%s2395_s7 + $0x28] sm:$0xff] }
   0x7   :  { %1699 = vmatpush3.msra.mxu0 %v1542_v3  ;;  %v135_v12 = vrot.slane %v2001_v11, %v134_v10  ;;  %v2117_v55 = vld [vmem:[%s2395_s7 + $0x20] sm:$0xff]  ;;  %v2124_v60 = vld [vmem:[%s2395_s7 + $0x30] sm:$0xff]  ;;  %v2131_v63 = vld [vmem:[%s2395_s7 + $0x38] sm:$0xff]  ;;  %s1928_s7 = smov 64  }
   0x8   :  { %1700 = vmatprep.subr.mxu0 %v1539_v5 }
   0x9   :  { %1701 = vmatpush3.msra.mxu0 %v1539_v5 }
   0xa   :  { %1702 = vmatprep.subr.mxu0 %v1538_v6 }
   0xb   :  { %1703 = vmatpush3.msra.mxu0 %v1538_v6 }
   0xc   :  { %1705 = vmatmul.mubr.msk.f32.vlgmr.msra.gmra.mxu0 %vm136_vm0, %v1991_v7 }
  0xcc   :  { %v1706_v13 = vpop.f32.mrf.mxu0 }
  0xcd   :  { %v2004_v14 = vadd.f32 %v1706_v13, %v135_v12 }
  0xce   :  { %v209_v15 = vpop.f32.mrf.mxu0 }
  0xcf   :  { %v2011_v17 = vadd.f32 %v209_v15, %v135_v12  ;;  %230 = vrot.lane.b32.xlu0 %v2004_v14, %s1927_s16  ;;  %v219_v23 = vmul.f32 %v2004_v14, %v2025_v21  ;;  %v221_v27 = vmul.f32 %v2004_v14, %v2041_v25  ;;  %v223_v31 = vmul.f32 %v2004_v14, %v2057_v29 }
  0xd0   :  { %v225_v34 = vmul.f32 %v2004_v14, %v2073_v33 }
  0xd1   :  { %v218_v18 = vmul.f32 %v2011_v17, %v2009_v16  ;;  %v220_v24 = vmul.f32 %v2011_v17, %v2031_v22  ;;  %v222_v28 = vmul.f32 %v2011_v17, %v2047_v26  ;;  %v224_v32 = vmul.f32 %v2011_v17, %v2063_v30 }
  0xd3   :  { %228 = vrot.lane.b32.xlu0 %v2011_v17, %s1927_s16  ;;  %1711 = vmatprep.mubr.msk.f32.mxu1 %vm136_vm0, %v218_v18 }
 0x141   :  { %v231_v19 = vpop.permute.xlu0 %230 }
 0x142   :  { %1707 = vmatprep.subr.msk.mxu1 %vm136_vm0, %v231_v19 }
 0x143   :  { %1708 = vmatpush3.xpose.msk.msra.mxu1 %vm136_vm0, %v231_v19 }
 0x145   :  { %v229_v20 = vpop.permute.xlu0 %228 }
 0x146   :  { %1709 = vmatprep.subr.msk.mxu1 %vm136_vm0, %v229_v20 }
 0x147   :  { %1710 = vmatpush3.xpose.msk.msra.mxu1 %vm136_vm0, %v229_v20 }
 0x14a   :  { %1712 = vmatmul.mubr.msk.f32.vlgmr.msra.gmra.mxu1 %vm136_vm0, %v219_v23 }
 0x14b   :  { %1714 = vmatprep.mubr.msk.f32.mxu1 %vm136_vm0, %v220_v24 }
 0x14e   :  { %1715 = vmatmul.mubr.msk.f32.gmra.mxu1 %vm136_vm0, %v221_v27 }
 0x14f   :  { %1717 = vmatprep.mubr.msk.f32.mxu1 %vm136_vm0, %v222_v28 }
 0x152   :  { %1718 = vmatmul.mubr.msk.f32.gmra.mxu1 %vm136_vm0, %v223_v31 }
 0x153   :  { %1720 = vmatprep.mubr.msk.f32.mxu1 %vm136_vm0, %v224_v32 }
 0x156   :  { %1721 = vmatmul.mubr.msk.f32.gmra.mxu1 %vm136_vm0, %v225_v34 }
 0x20a   :  { %v1713_v36 = vpop.f32.mrf.mxu1 }
 0x20b   :  { %v332_v38 = vadd.f32 %v1713_v36, %v2083_v35 }
 0x20c   :  { %v326_v39 = vpop.f32.mrf.mxu1 }
 0x20d   :  { %v327_v40 = vadd.f32 %v326_v39, %v2088_v37  ;;  %v369_v41 = vsel %vm365_vm1, %v332_v38, -inf }
 0x20e   :  { %370 = vmax.xlane.f32.xlu1 %v369_v41  ;;  %v1716_v43 = vpop.f32.mrf.mxu1 }
 0x20f   :  { %v342_v46 = vadd.f32 %v1716_v43, %v2096_v42  ;;  %v366_v48 = vsel %vm365_vm1, %v327_v40, -inf }
 0x210   :  { %v336_v45 = vpop.f32.mrf.mxu1 }
 0x211   :  { %v337_v47 = vadd.f32 %v336_v45, %v2101_v44  ;;  %v375_v54 = vsel %vm365_vm1, %v342_v46, -inf }
 0x212   :  { %v1719_v50 = vpop.f32.mrf.mxu1  ;;  %367 = vmax.xlane.f32.xlu1 %v366_v48 }
 0x213   :  { %v372_v51 = vsel %vm365_vm1, %v337_v47, -inf  ;;  %v352_v53 = vadd.f32 %v1719_v50, %v2109_v49 }
 0x214   :  { %v346_v52 = vpop.f32.mrf.mxu1  ;;  %373 = vmax.xlane.f32.xlu0 %v372_v51 }
 0x215   :  { %v347_v57 = vadd.f32 %v346_v52, %v2117_v55  ;;  %v381_v58 = vsel %vm365_vm1, %v352_v53, -inf }
 0x216   :  { %v1722_v56 = vpop.f32.mrf.mxu1  ;;  %376 = vmax.xlane.f32.xlu1 %v375_v54 }
 0x217   :  { %v378_v62 = vsel %vm365_vm1, %v347_v57, -inf  ;;  %v362_v0 = vadd.f32 %v1722_v56, %v2131_v63 }
 0x218   :  { %v356_v59 = vpop.f32.mrf.mxu1 }
 0x219   :  { %v357_v61 = vadd.f32 %v356_v59, %v2124_v60  ;;  %v387_v3 = vsel %vm365_vm1, %v362_v0, -inf }
 0x21a   :  { %382 = vmax.xlane.f32.xlu1 %v381_v58 }
 0x21b   :  { %v384_v1 = vsel %vm365_vm1, %v357_v61, -inf }
 0x21e   :  { %379 = vmax.xlane.f32.xlu1 %v378_v62 }
 0x222   :  { %385 = vmax.xlane.f32.xlu1 %v384_v1 }
 0x226   :  { %388 = vmax.xlane.f32.xlu1 %v387_v3 }
 0x297   :  { %v371_v4 = vpop.xlane.xlu1 %370 }
 0x298   :  { %v391_v5 = vsub.f32 %v332_v38, %v371_v4 }
 0x29a   :  { %v400_v6 = vmul.f32 1.442695, %v391_v5 }
 0x29b   :  { %v368_v8 = vpop.xlane.xlu1 %367 }
 0x29c   :  { %1842 = vpow2.f32 %v400_v6  ;;  %v390_v10 = vsub.f32 %v327_v40, %v368_v8 }
 0x29d   :  { %v374_v12 = vpop.xlane.xlu0 %373 }
 0x29e   :  { %v398_v13 = vmul.f32 1.442695, %v390_v10  ;;  %v392_v15 = vsub.f32 %v337_v47, %v374_v12 }
 0x29f   :  { %v377_v18 = vpop.xlane.xlu1 %376 }
 0x2a0   :  { %1844 = vpow2.f32 %v398_v13  ;;  %v402_v19 = vmul.f32 1.442695, %v392_v15  ;;  %v393_v20 = vsub.f32 %v342_v46, %v377_v18 }
 0x2a2   :  { %1846 = vpow2.f32 %v402_v19  ;;  %v404_v23 = vmul.f32 1.442695, %v393_v20 }
 0x2a3   :  { %v383_v24 = vpop.xlane.xlu1 %382 }
 0x2a4   :  { %1848 = vpow2.f32 %v404_v23  ;;  %v395_v27 = vsub.f32 %v352_v53, %v383_v24 }
 0x2a6   :  { %v408_v28 = vmul.f32 1.442695, %v395_v27 }
 0x2a7   :  { %v380_v31 = vpop.xlane.xlu1 %379 }
 0x2a8   :  { %1850 = vpow2.f32 %v408_v28  ;;  %v394_v32 = vsub.f32 %v347_v57, %v380_v31 }
 0x2a9   :  { %v2136_v34 = vpop.eup %1842 }
 0x2aa   :  { %v406_v36 = vmul.f32 1.442695, %v394_v32  ;;  %v417_v38 = vsel %vm365_vm1, %v2136_v34, 0.0 }
 0x2ab   :  { %418 = vadd.xlane.f32.xlu1 %v417_v38  ;;  %v386_v39 = vpop.xlane.xlu1 %385 }
 0x2ac   :  { %1852 = vpow2.f32 %v406_v36  ;;  %v396_v40 = vsub.f32 %v357_v61, %v386_v39 }
 0x2ad   :  { %v1845_v41 = vpop.eup %1844 }
 0x2ae   :  { %v410_v43 = vmul.f32 1.442695, %v396_v40  ;;  %v414_v45 = vsel %vm365_vm1, %v1845_v41, 0.0 }
 0x2af   :  { %v1847_v46 = vpop.eup %1846  ;;  %415 = vadd.xlane.f32.xlu1 %v414_v45  ;;  %v389_v47 = vpop.xlane.xlu1 %388 }
 0x2b0   :  { %1854 = vpow2.f32 %v410_v43  ;;  %v397_v48 = vsub.f32 %v362_v0, %v389_v47  ;;  %v420_v52 = vsel %vm365_vm1, %v1847_v46, 0.0 }
 0x2b1   :  { %v1849_v50 = vpop.eup %1848 }
 0x2b2   :  { %v412_v51 = vmul.f32 1.442695, %v397_v48  ;;  %v423_v53 = vsel %vm365_vm1, %v1849_v50, 0.0 }
 0x2b3   :  { %421 = vadd.xlane.f32.xlu1 %v420_v52  ;;  %424 = vadd.xlane.f32.xlu0 %v423_v53  ;;  %v2169_v53 = vld [vmem:[%s2396_s6 + $0x10] sm:$0xff] }
 0x2b4   :  { %1856 = vpow2.f32 %v412_v51 }
 0x2b5   :  { %v1851_v54 = vpop.eup %1850 }
 0x2b6   :  { %v429_v56 = vsel %vm365_vm1, %v1851_v54, 0.0 }
 0x2b7   :  { %430 = vadd.xlane.f32.xlu0 %v429_v56  ;;  %v2174_v56 = vld [vmem:[%s2396_s6 + $0x18] sm:$0xff] }
 0x2b9   :  { %v1853_v57 = vpop.eup %1852 }
 0x2ba   :  { %v426_v58 = vsel %vm365_vm1, %v1853_v57, 0.0 }
 0x2bb   :  { %427 = vadd.xlane.f32.xlu1 %v426_v58 }
 0x2bd   :  { %v1855_v59 = vpop.eup %1854 }
 0x2be   :  { %v432_v61 = vsel %vm365_vm1, %v1855_v59, 0.0 }
 0x2bf   :  { %433 = vadd.xlane.f32.xlu1 %v432_v61  ;;  %v2189_v61 = vld [vmem:[%s2396_s6 + $0x8] sm:$0xff] }
 0x2c1   :  { %v1857_v62 = vpop.eup %1856 }
 0x2c2   :  { %v435_v0 = vsel %vm365_vm1, %v1857_v62, 0.0 }
 0x2c3   :  { %436 = vadd.xlane.f32.xlu0 %v435_v0  ;;  %v2195_v0 = vld [vmem:[%s2396_s6 + $0x28] sm:$0xff] }
 0x2d0   :  { %456 = vrot.lane.b32.xlu1 %v2004_v14, %s1928_s7 }
 0x2d9   :  { %454 = vrot.lane.b32.xlu0 %v2011_v17, %s1928_s7 }
 0x334   :  { %v419_v1 = vpop.xlane.xlu1 %418 }
 0x338   :  { %v416_v3 = vpop.xlane.xlu1 %415 }
 0x339   :  { %1858 = vrcp.f32 %v416_v3 }
 0x33a   :  { %1860 = vrcp.f32 %v419_v1 }
 0x33c   :  { %v422_v4 = vpop.xlane.xlu1 %421  ;;  %v425_v5 = vpop.xlane.xlu0 %424 }
 0x33d   :  { %1862 = vrcp.f32 %v422_v4 }
 0x33e   :  { %1864 = vrcp.f32 %v425_v5 }
 0x340   :  { %v431_v10 = vpop.xlane.xlu0 %430 }
 0x344   :  { %v428_v6 = vpop.xlane.xlu1 %427 }
 0x345   :  { %1866 = vrcp.f32 %v428_v6  ;;  %v2203_v6 = vld [vmem:[%s2396_s6 + $0x38] sm:$0xff] }
 0x346   :  { %v1859_v8 = vpop.eup %1858  ;;  %1868 = vrcp.f32 %v431_v10 }
 0x347   :  { %v446_v12 = vmul.f32 %v1859_v8, %v1845_v41  ;;  %v1861_v15 = vpop.eup %1860  ;;  %v1604_v41 = vld [vmem:[%s2391_s1 + $0x28] sm:$0xff]  }
 0x348   :  { %v434_v13 = vpop.xlane.xlu1 %433  ;;  %v447_v20 = vmul.f32 %v1861_v15, %v2136_v34  ;;  %v1559_v43 = vunpack.c.h.bf16 %v1604_v41  ;;  %v1558_v45 = vunpack.c.l.bf16 %v1604_v41 }
 0x349   :  { %1727 = vmatprep.mubr.msk.f32.mxu0 %vm365_vm1, %v446_v12  ;;  %1870 = vrcp.f32 %v434_v13  ;;  %v2210_v13 = vld [vmem:[%s2396_s6 + $0x30] sm:$0xff] }
 0x34a   :  { %v1863_v18 = vpop.eup %1862  ;;  %1739 = vmatprep.subr.mxu1 %v1559_v43 }
 0x34b   :  { %v1865_v23 = vpop.eup %1864  ;;  %v448_v24 = vmul.f32 %v1863_v18, %v1847_v46  ;;  %1740 = vmatpush3.msra.mxu1 %v1559_v43  ;;  %v1603_v46 = vld [vmem:[%s2391_s1 + $0x20] sm:$0xff]  }
 0x34c   :  { %v437_v14 = vpop.xlane.xlu0 %436  ;;  %v457_v17 = vpop.permute.xlu1 %456  ;;  %v449_v28 = vmul.f32 %v1865_v23, %v1849_v50  ;;  %1741 = vmatprep.subr.mxu1 %v1558_v45  ;;  %v1555_v47 = vunpack.c.h.bf16 %v1603_v46  ;;  %v1554_v48 = vunpack.c.l.bf16 %v1603_v46  ;;  %v1601_v46 = vld [vmem:[%s2391_s1 + $0x10] sm:$0xff]  }
 0x34d   :  { %1872 = vrcp.f32 %v437_v14  ;;  %1723 = vmatprep.subr.mxu0 %v457_v17  ;;  %1742 = vmatpush3.msra.mxu1 %v1558_v45  ;;  %v1602_v45 = vld [vmem:[%s2391_s1 + $0x18] sm:$0xff]  }
 0x34e   :  { %1724 = vmatpush3.msra.mxu0 %v457_v17  ;;  %1743 = vmatprep.subr.mxu1 %v1555_v47 }
 0x34f   :  { %1744 = vmatpush3.msra.mxu1 %v1555_v47  ;;  %v1551_v47 = vunpack.c.h.bf16 %v1602_v45 }
 0x350   :  { %v455_v19 = vpop.permute.xlu0 %454  ;;  %1745 = vmatprep.subr.mxu1 %v1554_v48 }
 0x351   :  { %1725 = vmatprep.subr.mxu0 %v455_v19  ;;  %1746 = vmatpush3.msra.mxu1 %v1554_v48  ;;  %v1550_v48 = vunpack.c.l.bf16 %v1602_v45 }
 0x352   :  { %1726 = vmatpush3.msra.mxu0 %v455_v19  ;;  %v1867_v27 = vpop.eup %1866 }
 0x353   :  { %1728 = vmatmul.mubr.msk.f32.vlgmr.msra.gmra.mxu0 %vm365_vm1, %v447_v20  ;;  %v1869_v31 = vpop.eup %1868  ;;  %v450_v32 = vmul.f32 %v1867_v27, %v1853_v57  ;;  %v2179_v57 = vld [vmem:[%s2396_s6] sm:$0xff]  ;;  %1750 = vmatprep.subr.mxu0 %v1551_v47 }
 0x354   :  { %1730 = vmatprep.mubr.msk.f32.mxu0 %vm365_vm1, %v448_v24  ;;  %v451_v38 = vmul.f32 %v1869_v31, %v1851_v54  ;;  %1751 = vmatpush3.msra.mxu0 %v1551_v47 }
 0x355   :  { %1752 = vmatprep.subr.mxu0 %v1550_v48 }
 0x356   :  { %v1871_v36 = vpop.eup %1870  ;;  %1753 = vmatpush3.msra.mxu0 %v1550_v48 }
 0x357   :  { %1731 = vmatmul.mubr.msk.f32.gmra.mxu0 %vm365_vm1, %v449_v28  ;;  %v452_v40 = vmul.f32 %v1871_v36, %v1855_v59  ;;  %v2184_v59 = vld [vmem:[%s2396_s6 + $0x20] sm:$0xff]  ;;  %v605_v28 = vsub.s32 1, %v1995_v9 }
 0x358   :  { %1733 = vmatprep.mubr.msk.f32.mxu0 %vm365_vm1, %v450_v32 }
 0x359   :  { %v606_v31 = vrot.slane %v2001_v11, %v605_v28 }
 0x35a   :  { %v1873_v39 = vpop.eup %1872 }
 0x35b   :  { %1734 = vmatmul.mubr.msk.f32.gmra.mxu0 %vm365_vm1, %v451_v38  ;;  %v453_v34 = vmul.f32 %v1873_v39, %v1857_v62 }
 0x35c   :  { %1736 = vmatprep.mubr.msk.f32.mxu0 %vm365_vm1, %v452_v40 }
 0x35f   :  { %1737 = vmatmul.mubr.msk.f32.gmra.mxu0 %vm365_vm1, %v453_v34 }
 0x413   :  { %v1729_v50 = vpop.f32.mrf.mxu0 }
 0x414   :  { %v590_v8 = vmul.f32 %v1729_v50, %v2189_v61  ;;  %v1547_v50 = vunpack.c.h.bf16 %v1601_v46 }
 0x415   :  { %v550_v51 = vpop.f32.mrf.mxu0 }
 0x416   :  { %v589_v4 = vmul.f32 %v550_v51, %v2179_v57  ;;  %1754 = vmatprep.subr.mxu0 %v1547_v50 }
 0x417   :  { %v1732_v52 = vpop.f32.mrf.mxu0  ;;  %1755 = vmatpush3.msra.mxu0 %v1547_v50 }
 0x418   :  { %v592_v1 = vmul.f32 %v1732_v52, %v2174_v56 }
 0x419   :  { %v560_v54 = vpop.f32.mrf.mxu0 }
 0x41a   :  { %v591_v62 = vmul.f32 %v560_v54, %v2169_v53  ;;  %v598_v17 = vadd.f32 %v592_v1, %v590_v8  ;;  %v706_v1 = vsub.s32 4, %v1995_v9 }
 0x41b   :  { %v1735_v58 = vpop.f32.mrf.mxu0 }
 0x41c   :  { %v594_v10 = vmul.f32 %v1735_v58, %v2195_v0  ;;  %v597_v14 = vadd.f32 %v591_v62, %v589_v4  ;;  %v707_v8 = vrot.slane %v2001_v11, %v706_v1 }
 0x41d   :  { %v570_v3 = vpop.f32.mrf.mxu0 }
 0x41e   :  { %v593_v5 = vmul.f32 %v570_v3, %v2184_v59  ;;  %v600_v23 = vadd.f32 %v598_v17, %v594_v10  ;;  %v712_v17 = vsub.s32 2, %v1995_v9 }
 0x41f   :  { %v1738_v12 = vpop.f32.mrf.mxu0 }
 0x420   :  { %v596_v15 = vmul.f32 %v1738_v12, %v2203_v6  ;;  %v599_v19 = vadd.f32 %v597_v14, %v593_v5 }
 0x421   :  { %v580_v18 = vpop.f32.mrf.mxu0 }
 0x422   :  { %v595_v20 = vmul.f32 %v580_v18, %v2210_v13  ;;  %v602_v27 = vadd.f32 %v600_v23, %v596_v15  ;;  %v713_v15 = vrot.slane %v2001_v11, %v712_v17 }
 0x424   :  { %v601_v24 = vadd.f32 %v599_v19, %v595_v20 }
 0x426   :  { %1747 = vmatprep.mubr.msk.f32.mxu1 %vm136_vm0, %v601_v24 }
 0x427   :  { %1748 = vmatmul.mubr.msk.f32.vlgmr.msra.gmra.mxu1 %vm136_vm0, %v602_v27 }
 0x4e7   :  { %v1749_v32 = vpop.f32.mrf.mxu1 }
 0x4e8   :  { %v685_v36 = vadd.f32 %v1749_v32, %v606_v31 }
 0x4e9   :  { %v679_v38 = vpop.f32.mrf.mxu1 }
 0x4ea   :  { %v689_v39 = vadd.f32 %v685_v36, %v1991_v7  ;;  %v680_v40 = vadd.f32 %v679_v38, %v606_v31  ;;  %v1546_v7 = vunpack.c.l.bf16 %v1601_v46 }
 0x4ec   :  { %v688_v34 = vadd.f32 %v680_v40, %v1984_v2  ;;  %v691_v41 = vmul.f32 %v689_v39, %v689_v39  ;;  %1756 = vmatprep.subr.mxu0 %v1546_v7 }
 0x4ed   :  { %1757 = vmatpush3.msra.mxu0 %v1546_v7 }
 0x4ee   :  { %694 = vadd.xlane.f32.xlu0 %v691_v41  ;;  %v690_v43 = vmul.f32 %v688_v34, %v688_v34 }
 0x4f0   :  { %692 = vadd.xlane.f32.xlu1 %v690_v43 }
 0x577   :  { %v695_v2 = vpop.xlane.xlu0 %694 }
 0x578   :  { %v697_v51 = vmul.f32 0.03125, %v695_v2 }
 0x579   :  { %v693_v52 = vpop.xlane.xlu1 %692 }
 0x57a   :  { %v699_v54 = vadd.f32 1e-05, %v697_v51  ;;  %v696_v58 = vmul.f32 0.03125, %v693_v52 }
 0x57c   :  { %1874 = vrsqrt.f32 %v699_v54  ;;  %v698_v62 = vadd.f32 1e-05, %v696_v58 }
 0x57e   :  { %1876 = vrsqrt.f32 %v698_v62 }
 0x589   :  { %v1875_v3 = vpop.eup %1874 }
 0x58a   :  { %v703_v5 = vmul.f32 %v1875_v3, %v689_v39 }
 0x58b   :  { %v1877_v4 = vpop.eup %1876 }
 0x58c   :  { %v702_v10 = vmul.f32 %v1877_v4, %v688_v34  ;;  %v2230_v14 = vmul.f32 %v707_v8, %v703_v5 }
 0x58e   :  { %v2228_v12 = vmul.f32 %v707_v8, %v702_v10 }
 0x590   :  { %1758 = vmatprep.mubr.msk.f32.mxu0 %vm136_vm0, %v2228_v12 }
 0x591   :  { %1759 = vmatmul.mubr.msk.f32.vlgmr.msra.gmra.mxu0 %vm136_vm0, %v2230_v14 }
 0x651   :  { %v1760_v18 = vpop.f32.mrf.mxu0 }
 0x652   :  { %v2238_v19 = vadd.f32 %v1760_v18, %v713_v15 }
 0x653   :  { %v786_v20 = vpop.f32.mrf.mxu0 }
 0x654   :  { %v2240_v23 = vadd.f32 %v786_v20, %v713_v15  ;;  %807 = vrot.lane.b32.xlu1 %v2238_v19, %s1927_s16  ;;  %v796_v31 = vmul.f32 %v2238_v19, %v2025_v21  ;;  %v800_v21 = vmul.f32 %v2238_v19, %v2057_v29 }
 0x656   :  { %805 = vrot.lane.b32.xlu0 %v2240_v23, %s1927_s16  ;;  %v795_v24 = vmul.f32 %v2240_v23, %v2009_v16  ;;  %v797_v32 = vmul.f32 %v2240_v23, %v2031_v22  ;;  %v798_v16 = vmul.f32 %v2238_v19, %v2041_v25  ;;  %v799_v36 = vmul.f32 %v2240_v23, %v2047_v26 }
 0x657   :  { %v801_v22 = vmul.f32 %v2240_v23, %v2063_v30  ;;  %v802_v25 = vmul.f32 %v2238_v19, %v2073_v33 }
 0x658   :  { %1765 = vmatprep.mubr.msk.f32.mxu1 %vm136_vm0, %v795_v24 }
 0x6c6   :  { %v808_v27 = vpop.permute.xlu1 %807 }
 0x6c7   :  { %1761 = vmatprep.subr.msk.mxu1 %vm136_vm0, %v808_v27 }
 0x6c8   :  { %1762 = vmatpush3.xpose.msk.msra.mxu1 %vm136_vm0, %v808_v27  ;;  %v806_v28 = vpop.permute.xlu0 %805 }
 0x6c9   :  { %1763 = vmatprep.subr.msk.mxu1 %vm136_vm0, %v806_v28 }
 0x6cc   :  { %1764 = vmatpush3.xpose.msk.msra.mxu1 %vm136_vm0, %v806_v28 }
 0x6cf   :  { %1766 = vmatmul.mubr.msk.f32.vlgmr.msra.gmra.mxu1 %vm136_vm0, %v796_v31 }
 0x6d0   :  { %1768 = vmatprep.mubr.msk.f32.mxu1 %vm136_vm0, %v797_v32 }
 0x6d3   :  { %1769 = vmatmul.mubr.msk.f32.gmra.mxu1 %vm136_vm0, %v798_v16 }
 0x6d4   :  { %1771 = vmatprep.mubr.msk.f32.mxu1 %vm136_vm0, %v799_v36 }
 0x6d7   :  { %1772 = vmatmul.mubr.msk.f32.gmra.mxu1 %vm136_vm0, %v800_v21 }
 0x6d8   :  { %1774 = vmatprep.mubr.msk.f32.mxu1 %vm136_vm0, %v801_v22 }
 0x6db   :  { %1775 = vmatmul.mubr.msk.f32.gmra.mxu1 %vm136_vm0, %v802_v25 }
 0x78f   :  { %v1767_v26 = vpop.f32.mrf.mxu1 }
 0x790   :  { %v909_v38 = vadd.f32 %v1767_v26, %v2083_v35 }
 0x791   :  { %v903_v39 = vpop.f32.mrf.mxu1 }
 0x792   :  { %v904_v40 = vadd.f32 %v903_v39, %v2088_v37  ;;  %v945_v29 = vsel %vm365_vm1, %v909_v38, -inf }
 0x793   :  { %946 = vmax.xlane.f32.xlu0 %v945_v29  ;;  %v1770_v34 = vpop.f32.mrf.mxu1 }
 0x794   :  { %v919_v30 = vadd.f32 %v1770_v34, %v2096_v42  ;;  %v942_v41 = vsel %vm365_vm1, %v904_v40, -inf }
 0x795   :  { %v913_v43 = vpop.f32.mrf.mxu1  ;;  %943 = vmax.xlane.f32.xlu1 %v942_v41 }
 0x796   :  { %v914_v33 = vadd.f32 %v913_v43, %v2101_v44  ;;  %v951_v45 = vsel %vm365_vm1, %v919_v30, -inf }
 0x797   :  { %952 = vmax.xlane.f32.xlu0 %v951_v45  ;;  %v1773_v46 = vpop.f32.mrf.mxu1 }
 0x798   :  { %v929_v35 = vadd.f32 %v1773_v46, %v2109_v49  ;;  %v948_v37 = vsel %vm365_vm1, %v914_v33, -inf }
 0x799   :  { %v923_v47 = vpop.f32.mrf.mxu1  ;;  %949 = vmax.xlane.f32.xlu1 %v948_v37 }
 0x79a   :  { %v924_v48 = vadd.f32 %v923_v47, %v2117_v55  ;;  %v957_v42 = vsel %vm365_vm1, %v929_v35, -inf }
 0x79b   :  { %958 = vmax.xlane.f32.xlu0 %v957_v42  ;;  %v1776_v50 = vpop.f32.mrf.mxu1 }
 0x79c   :  { %v939_v7 = vadd.f32 %v1776_v50, %v2131_v63  ;;  %v954_v44 = vsel %vm365_vm1, %v924_v48, -inf }
 0x79d   :  { %v933_v2 = vpop.f32.mrf.mxu1  ;;  %955 = vmax.xlane.f32.xlu1 %v954_v44 }
 0x79e   :  { %v934_v51 = vadd.f32 %v933_v2, %v2124_v60  ;;  %v963_v49 = vsel %vm365_vm1, %v939_v7, -inf }
 0x79f   :  { %964 = vmax.xlane.f32.xlu0 %v963_v49 }
 0x7a0   :  { %v960_v52 = vsel %vm365_vm1, %v934_v51, -inf }
 0x7a1   :  { %961 = vmax.xlane.f32.xlu1 %v960_v52 }
 0x81c   :  { %v947_v54 = vpop.xlane.xlu0 %946 }
 0x81d   :  { %v967_v55 = vsub.f32 %v909_v38, %v947_v54 }
 0x81e   :  { %v944_v58 = vpop.xlane.xlu1 %943 }
 0x81f   :  { %v976_v62 = vmul.f32 1.442695, %v967_v55  ;;  %v966_v1 = vsub.f32 %v904_v40, %v944_v58 }
 0x820   :  { %v953_v3 = vpop.xlane.xlu0 %952 }
 0x821   :  { %1878 = vpow2.f32 %v976_v62  ;;  %v974_v63 = vmul.f32 1.442695, %v966_v1  ;;  %v969_v4 = vsub.f32 %v919_v30, %v953_v3 }
 0x822   :  { %v950_v5 = vpop.xlane.xlu1 %949 }
 0x823   :  { %1880 = vpow2.f32 %v974_v63  ;;  %v980_v8 = vmul.f32 1.442695, %v969_v4  ;;  %v968_v10 = vsub.f32 %v914_v33, %v950_v5 }
 0x824   :  { %v959_v60 = vpop.xlane.xlu0 %958 }
 0x825   :  { %1882 = vpow2.f32 %v980_v8  ;;  %v978_v17 = vmul.f32 1.442695, %v968_v10  ;;  %v971_v15 = vsub.f32 %v929_v35, %v959_v60 }
 0x826   :  { %v956_v18 = vpop.xlane.xlu1 %955 }
 0x827   :  { %1884 = vpow2.f32 %v978_v17  ;;  %v984_v20 = vmul.f32 1.442695, %v971_v15  ;;  %v970_v24 = vsub.f32 %v924_v48, %v956_v18  ;;  %v1606_v18 = vld [vmem:[%s2391_s1 + $0x38] sm:$0xff]  }
 0x828   :  { %v965_v27 = vpop.xlane.xlu0 %964 }
 0x829   :  { %1886 = vpow2.f32 %v984_v20  ;;  %v982_v28 = vmul.f32 1.442695, %v970_v24  ;;  %v973_v31 = vsub.f32 %v939_v7, %v965_v27  ;;  %v1567_v20 = vunpack.c.h.bf16 %v1606_v18  ;;  %v1605_v27 = vld [vmem:[%s2391_s1 + $0x30] sm:$0xff]  }
 0x82a   :  { %v962_v32 = vpop.xlane.xlu1 %961  ;;  %v1566_v24 = vunpack.c.l.bf16 %v1606_v18 }
 0x82b   :  { %1888 = vpow2.f32 %v982_v28  ;;  %v988_v16 = vmul.f32 1.442695, %v973_v31  ;;  %v972_v36 = vsub.f32 %v934_v51, %v962_v32  ;;  %1793 = vmatprep.subr.mxu1 %v1567_v20  ;;  %v1563_v28 = vunpack.c.h.bf16 %v1605_v27 }
 0x82c   :  { %1794 = vmatpush3.msra.mxu1 %v1567_v20  ;;  %v1562_v31 = vunpack.c.l.bf16 %v1605_v27  ;;  %v1613_v27 = vld [vmem:[%s2398_s3 + $0x38] sm:$0xff]  }
 0x82d   :  { %1890 = vpow2.f32 %v988_v16  ;;  %v986_v21 = vmul.f32 1.442695, %v972_v36  ;;  %1795 = vmatprep.subr.mxu1 %v1566_v24 }
 0x82e   :  { %v1879_v22 = vpop.eup %1878  ;;  %1796 = vmatpush3.msra.mxu1 %v1566_v24 }
 0x82f   :  { %1892 = vpow2.f32 %v986_v21  ;;  %v993_v25 = vsel %vm365_vm1, %v1879_v22, 0.0  ;;  %1797 = vmatprep.subr.mxu1 %v1563_v28 }
 0x830   :  { %v1881_v26 = vpop.eup %1880  ;;  %994 = vadd.xlane.f32.xlu0 %v993_v25  ;;  %1798 = vmatpush3.msra.mxu1 %v1563_v28  ;;  %v1599_v28 = vunpack.c.h.bf16 %v1613_v27 }
 0x831   :  { %v990_v38 = vsel %vm365_vm1, %v1881_v26, 0.0  ;;  %1799 = vmatprep.subr.mxu1 %v1562_v31 }
 0x832   :  { %v1883_v39 = vpop.eup %1882  ;;  %991 = vadd.xlane.f32.xlu1 %v990_v38  ;;  %1800 = vmatpush3.msra.mxu1 %v1562_v31  ;;  %v1598_v31 = vunpack.c.l.bf16 %v1613_v27 }
 0x833   :  { %v999_v40 = vsel %vm365_vm1, %v1883_v39, 0.0 }
 0x834   :  { %v1885_v29 = vpop.eup %1884  ;;  %1000 = vadd.xlane.f32.xlu0 %v999_v40 }
 0x835   :  { %v996_v34 = vsel %vm365_vm1, %v1885_v29, 0.0 }
 0x836   :  { %v1887_v30 = vpop.eup %1886  ;;  %997 = vadd.xlane.f32.xlu1 %v996_v34 }
 0x837   :  { %v1005_v41 = vsel %vm365_vm1, %v1887_v30, 0.0 }
 0x838   :  { %v1889_v43 = vpop.eup %1888  ;;  %1006 = vadd.xlane.f32.xlu0 %v1005_v41 }
 0x839   :  { %v1002_v33 = vsel %vm365_vm1, %v1889_v43, 0.0 }
 0x83a   :  { %v1891_v45 = vpop.eup %1890  ;;  %1003 = vadd.xlane.f32.xlu1 %v1002_v33 }
 0x83b   :  { %v1011_v46 = vsel %vm365_vm1, %v1891_v45, 0.0 }
 0x83c   :  { %v1893_v35 = vpop.eup %1892  ;;  %1012 = vadd.xlane.f32.xlu0 %v1011_v46 }
 0x83d   :  { %v1008_v37 = vsel %vm365_vm1, %v1893_v35, 0.0 }
 0x83e   :  { %1009 = vadd.xlane.f32.xlu1 %v1008_v37 }
 0x84f   :  { %1032 = vrot.lane.b32.xlu1 %v2238_v19, %s1928_s7 }
 0x852   :  { %1030 = vrot.lane.b32.xlu0 %v2240_v23, %s1928_s7 }
 0x8b9   :  { %v995_v47 = vpop.xlane.xlu0 %994 }
 0x8bb   :  { %v992_v48 = vpop.xlane.xlu1 %991 }
 0x8bc   :  { %1894 = vrcp.f32 %v992_v48 }
 0x8bd   :  { %v1001_v42 = vpop.xlane.xlu0 %1000  ;;  %1896 = vrcp.f32 %v995_v47 }
 0x8bf   :  { %v998_v50 = vpop.xlane.xlu1 %997 }
 0x8c0   :  { %1898 = vrcp.f32 %v998_v50 }
 0x8c1   :  { %v1007_v7 = vpop.xlane.xlu0 %1006  ;;  %1900 = vrcp.f32 %v1001_v42 }
 0x8c3   :  { %v1004_v44 = vpop.xlane.xlu1 %1003 }
 0x8c4   :  { %1902 = vrcp.f32 %v1004_v44  ;;  %v64_v44 = vld [vmem:[%s2397_s2 + $0x8] sm:$0xff] }
 0x8c5   :  { %1904 = vrcp.f32 %v1007_v7  ;;  %v1013_v2 = vpop.xlane.xlu0 %1012  ;;  %v66_v7 = vld [vmem:[%s2397_s2 + $0x18] sm:$0xff] }
 0x8c7   :  { %v1010_v51 = vpop.xlane.xlu1 %1009 }
 0x8c8   :  { %1906 = vrcp.f32 %v1010_v51 }
 0x8c9   :  { %v1895_v49 = vpop.eup %1894  ;;  %1908 = vrcp.f32 %v1013_v2  ;;  %v1031_v55 = vpop.permute.xlu0 %1030  ;;  %v73_v2 = vunpack.c.l.bf16 %v66_v7 }
 0x8ca   :  { %v1022_v19 = vmul.f32 %v1895_v49, %v1881_v26  ;;  %v1897_v52 = vpop.eup %1896 }
 0x8cb   :  { %v1033_v23 = vpop.permute.xlu1 %1032  ;;  %v1023_v58 = vmul.f32 %v1897_v52, %v1879_v22  ;;  %v70_v52 = vunpack.c.h.bf16 %v64_v44 }
 0x8cc   :  { %1777 = vmatprep.subr.mxu0 %v1033_v23  ;;  %1781 = vmatprep.mubr.msk.f32.mxu0 %vm365_vm1, %v1022_v19  ;;  %v63_v19 = vld [vmem:[%s2397_s2] sm:$0xff] }
 0x8cd   :  { %v1899_v54 = vpop.eup %1898  ;;  %1778 = vmatpush3.msra.mxu0 %v1033_v23  ;;  %v69_v23 = vunpack.c.l.bf16 %v64_v44 }
 0x8ce   :  { %1779 = vmatprep.subr.mxu0 %v1031_v55  ;;  %v1024_v62 = vmul.f32 %v1899_v54, %v1885_v29  ;;  %v1901_v1 = vpop.eup %1900  ;;  %v68_v54 = vunpack.c.h.bf16 %v63_v19 }
 0x8cf   :  { %1780 = vmatpush3.msra.mxu0 %v1031_v55  ;;  %v1025_v63 = vmul.f32 %v1901_v1, %v1883_v39  ;;  %v67_v55 = vunpack.c.l.bf16 %v63_v19 }
 0x8d0   :  { %1782 = vmatmul.mubr.msk.f32.vlgmr.msra.gmra.mxu0 %vm365_vm1, %v1023_v58  ;;  %1804 = vmatprep.subr.mxu0 %v1599_v28 }
 0x8d1   :  { %v1903_v3 = vpop.eup %1902  ;;  %1784 = vmatprep.mubr.msk.f32.mxu0 %vm365_vm1, %v1024_v62  ;;  %1805 = vmatpush3.msra.mxu0 %v1599_v28 }
 0x8d2   :  { %v1026_v4 = vmul.f32 %v1903_v3, %v1889_v43  ;;  %v1905_v5 = vpop.eup %1904  ;;  %1806 = vmatprep.subr.mxu0 %v1598_v31 }
 0x8d3   :  { %v1027_v10 = vmul.f32 %v1905_v5, %v1887_v30  ;;  %v1282_v5 = vsub.s32 5, %v1995_v9  ;;  %1807 = vmatpush3.msra.mxu0 %v1598_v31 }
 0x8d4   :  { %1785 = vmatmul.mubr.msk.f32.gmra.mxu0 %vm365_vm1, %v1025_v63 }
 0x8d5   :  { %v1907_v8 = vpop.eup %1906  ;;  %1787 = vmatprep.mubr.msk.f32.mxu0 %vm365_vm1, %v1026_v4 }
 0x8d6   :  { %v1028_v60 = vmul.f32 %v1907_v8, %v1893_v35  ;;  %v1909_v17 = vpop.eup %1908 }
 0x8d7   :  { %v1029_v15 = vmul.f32 %v1909_v17, %v1891_v45  ;;  %v2346_v17 = vld [vmem:[%s2393_s4] sm:$0xff] }
 0x8d8   :  { %1788 = vmatmul.mubr.msk.f32.gmra.mxu0 %vm365_vm1, %v1027_v10 }
 0x8d9   :  { %1790 = vmatprep.mubr.msk.f32.mxu0 %vm365_vm1, %v1028_v60 }
 0x8dc   :  { %1791 = vmatmul.mubr.msk.f32.gmra.mxu0 %vm365_vm1, %v1029_v15  ;;  %v1283_v15 = vrot.slane %v2346_v17, %v1282_v5 }
 0x990   :  { %v1783_v32 = vpop.f32.mrf.mxu0 }
 0x991   :  { %v1166_v29 = vmul.f32 %v1783_v32, %v2189_v61  ;;  %v1612_v32 = vld [vmem:[%s2398_s3 + $0x30] sm:$0xff]  }
 0x992   :  { %v1126_v16 = vpop.f32.mrf.mxu0 }
 0x993   :  { %v1165_v39 = vmul.f32 %v1126_v16, %v2179_v57  ;;  %v1181_v57 = vsub.s32 3, %v1995_v9  ;;  %v1595_v16 = vunpack.c.h.bf16 %v1612_v32 }
 0x994   :  { %v1786_v36 = vpop.f32.mrf.mxu0 }
 0x995   :  { %v1168_v26 = vmul.f32 %v1786_v36, %v2174_v56  ;;  %1808 = vmatprep.subr.mxu0 %v1595_v16  ;;  %v1594_v36 = vunpack.c.l.bf16 %v1612_v32 }
 0x996   :  { %v1136_v21 = vpop.f32.mrf.mxu0  ;;  %1809 = vmatpush3.msra.mxu0 %v1595_v16 }
 0x997   :  { %v1167_v25 = vmul.f32 %v1136_v21, %v2169_v53  ;;  %v1174_v43 = vadd.f32 %v1168_v26, %v1166_v29  ;;  %v1611_v21 = vld [vmem:[%s2398_s3 + $0x28] sm:$0xff]   ;;  %1810 = vmatprep.subr.mxu0 %v1594_v36  ;;  %v1610_v26 = vld [vmem:[%s2398_s3 + $0x20] sm:$0xff]  }
 0x998   :  { %v1789_v22 = vpop.f32.mrf.mxu0  ;;  %1811 = vmatpush3.msra.mxu0 %v1594_v36 }
 0x999   :  { %v1170_v34 = vmul.f32 %v1789_v22, %v2195_v0  ;;  %v1173_v41 = vadd.f32 %v1167_v25, %v1165_v39  ;;  %v1591_v22 = vunpack.c.h.bf16 %v1611_v21  ;;  %v1590_v25 = vunpack.c.l.bf16 %v1611_v21 }
 0x99a   :  { %v1146_v38 = vpop.f32.mrf.mxu0  ;;  %v1586_v39 = vunpack.c.l.bf16 %v1610_v26 }
 0x99b   :  { %v1169_v40 = vmul.f32 %v1146_v38, %v2184_v59  ;;  %v1176_v35 = vadd.f32 %v1174_v43, %v1170_v34  ;;  %v1182_v59 = vrot.slane %v2001_v11, %v1181_v57  ;;  %v65_v11 = vld [vmem:[%s2397_s2 + $0x10] sm:$0xff]  ;;  %1812 = vmatprep.subr.mxu0 %v1591_v22  ;;  %v1587_v38 = vunpack.c.h.bf16 %v1610_v26 }
 0x99c   :  { %v1792_v30 = vpop.f32.mrf.mxu0  ;;  %v72_v51 = vunpack.c.h.bf16 %v65_v11  ;;  %v71_v49 = vunpack.c.l.bf16 %v65_v11  ;;  %1813 = vmatpush3.msra.mxu0 %v1591_v22 }
 0x99d   :  { %v1172_v33 = vmul.f32 %v1792_v30, %v2203_v6  ;;  %v1175_v46 = vadd.f32 %v1173_v41, %v1169_v40  ;;  %1814 = vmatprep.subr.mxu0 %v1590_v25  ;;  %v1609_v40 = vld [vmem:[%s2398_s3 + $0x18] sm:$0xff]   ;;  %v1608_v30 = vld [vmem:[%s2398_s3 + $0x10] sm:$0xff]  }
 0x99e   :  { %v1156_v45 = vpop.f32.mrf.mxu0  ;;  %1815 = vmatpush3.msra.mxu0 %v1590_v25  ;;  %v1583_v29 = vunpack.c.h.bf16 %v1609_v40  ;;  %v1582_v34 = vunpack.c.l.bf16 %v1609_v40  ;;  %v1579_v41 = vunpack.c.h.bf16 %v1608_v30  ;;  %v1578_v43 = vunpack.c.l.bf16 %v1608_v30 }
 0x99f   :  { %v1171_v53 = vmul.f32 %v1156_v45, %v2210_v13  ;;  %v1178_v37 = vadd.f32 %v1176_v35, %v1172_v33  ;;  %1816 = vmatprep.subr.mxu0 %v1587_v38  ;;  %v1607_v33 = vld [vmem:[%s2398_s3 + $0x8] sm:$0xff]  }
 0x9a0   :  { %1817 = vmatpush3.msra.mxu0 %v1587_v38  ;;  %v1575_v45 = vunpack.c.h.bf16 %v1607_v33 }
 0x9a1   :  { %v1177_v56 = vadd.f32 %v1175_v46, %v1171_v53  ;;  %1818 = vmatprep.subr.mxu0 %v1586_v39  ;;  %v1574_v46 = vunpack.c.l.bf16 %v1607_v33  ;;  %v1569_v53 = vld [vmem:[%s2398_s3] sm:$0xff]  }
 0x9a2   :  { %1819 = vmatpush3.msra.mxu0 %v1586_v39  ;;  %v1571_v35 = vunpack.c.h.bf16 %v1569_v53 }
 0x9a3   :  { %1801 = vmatprep.mubr.msk.f32.mxu1 %vm136_vm0, %v1177_v56  ;;  %1820 = vmatprep.subr.mxu0 %v1583_v29  ;;  %v1570_v56 = vunpack.c.l.bf16 %v1569_v53 }
 0x9a4   :  { %1802 = vmatmul.mubr.msk.f32.vlgmr.msra.gmra.mxu1 %vm136_vm0, %v1178_v37  ;;  %1821 = vmatpush3.msra.mxu0 %v1583_v29 }
 0x9a5   :  { %1822 = vmatprep.subr.mxu0 %v1582_v34 }
 0x9a6   :  { %1823 = vmatpush3.msra.mxu0 %v1582_v34 }
 0x9a7   :  { %1824 = vmatprep.subr.mxu0 %v1579_v41 }
 0x9a8   :  { %1825 = vmatpush3.msra.mxu0 %v1579_v41 }
 0x9a9   :  { %1826 = vmatprep.subr.mxu0 %v1578_v43 }
 0x9aa   :  { %1827 = vmatpush3.msra.mxu0 %v1578_v43 }
 0x9ab   :  { %1828 = vmatprep.subr.mxu0 %v1575_v45 }
 0x9ac   :  { %1829 = vmatpush3.msra.mxu0 %v1575_v45 }
 0x9ad   :  { %1830 = vmatprep.subr.mxu0 %v1574_v46 }
 0x9ae   :  { %1831 = vmatpush3.msra.mxu0 %v1574_v46 }
 0x9af   :  { %1832 = vmatprep.subr.mxu0 %v1571_v35 }
 0x9b0   :  { %1833 = vmatpush3.msra.mxu0 %v1571_v35 }
 0x9b1   :  { %1834 = vmatprep.subr.mxu0 %v1570_v56 }
 0x9b2   :  { %1835 = vmatpush3.msra.mxu0 %v1570_v56 }
 0xa64   :  { %v1803_v61 = vpop.f32.mrf.mxu1 }
 0xa65   :  { %v1261_v0 = vadd.f32 %v1803_v61, %v1182_v59 }
 0xa66   :  { %v1255_v47 = vpop.f32.mrf.mxu1 }
 0xa67   :  { %v1265_v6 = vadd.f32 %v1261_v0, %v2230_v14  ;;  %v1256_v48 = vadd.f32 %v1255_v47, %v1182_v59  ;;  %v1929_v14 = vmov 0.0  }
 0xa68   :  { %1356 = vmatprep.mubr.f32.mxu1 %v1929_v14 }
 0xa69   :  { %v1264_v42 = vadd.f32 %v1256_v48, %v2228_v12  ;;  %v1267_v13 = vmul.f32 %v1265_v6, %v1265_v6  ;;  %v74_v12 = vunpack.c.h.bf16 %v66_v7 }
 0xa6b   :  { %1270 = vadd.xlane.f32.xlu0 %v1267_v13  ;;  %v1266_v50 = vmul.f32 %v1264_v42, %v1264_v42  ;;  %1316 = vmatprep.subr.mxu1 %v74_v12 }
 0xa6c   :  { %1317 = vmatpush1.msra.mxu1 %v73_v2 }
 0xa6d   :  { %1268 = vadd.xlane.f32.xlu1 %v1266_v50  ;;  %1318 = vmatprep.subr.mxu1 %v72_v51 }
 0xa6e   :  { %1319 = vmatpush1.msra.mxu1 %v71_v49 }
 0xa6f   :  { %1320 = vmatprep.subr.mxu1 %v70_v52 }
 0xa70   :  { %1321 = vmatpush1.msra.mxu1 %v69_v23 }
 0xa71   :  { %1322 = vmatprep.subr.mxu1 %v68_v54 }
 0xa72   :  { %1323 = vmatpush1.msra.mxu1 %v67_v55 }
 0xaf4   :  { %v1271_v58 = vpop.xlane.xlu0 %1270 }
 0xaf5   :  { %v1273_v62 = vmul.f32 0.03125, %v1271_v58 }
 0xaf6   :  { %v1269_v1 = vpop.xlane.xlu1 %1268 }
 0xaf7   :  { %v1275_v3 = vadd.f32 1e-05, %v1273_v62  ;;  %v1272_v63 = vmul.f32 0.03125, %v1269_v1 }
 0xaf9   :  { %v1274_v4 = vadd.f32 1e-05, %v1272_v63  ;;  %1910 = vrsqrt.f32 %v1275_v3  ;;  %v1478_v63 = vsub.s32 6, %v1995_v9 }
 0xafb   :  { %1912 = vrsqrt.f32 %v1274_v4  ;;  %v1479_v4 = vrot.slane %v2346_v17, %v1478_v63 }
 0xb06   :  { %v1911_v8 = vpop.eup %1910 }
 0xb07   :  { %v1279_v20 = vmul.f32 %v1911_v8, %v1265_v6 }
 0xb08   :  { %v1913_v10 = vpop.eup %1912 }
 0xb09   :  { %v1278_v60 = vmul.f32 %v1913_v10, %v1264_v42  ;;  %v2353_v24 = vmul.f32 %v1283_v15, %v1279_v20 }
 0xb0b   :  { %v2349_v18 = vmul.f32 %v1283_v15, %v1278_v60 }
 0xb0d   :  { %1532 = vmatmul.mubr.msk.f32.vlgmr.msra.gmra.mxu1 %vm136_vm0, %v2349_v18 }
 0xb0e   :  { %1362 = vmatprep.mubr.f32.mxu1 %v1929_v14 }
 0xb11   :  { %1533 = vmatmul.mubr.msk.f32.gmra.mxu1 %vm136_vm0, %v2353_v24 }
 0xbcd   :  { %v1358_v37 = vpop.f32.mrf.mxu1 }
 0xbce   :  { %v1534_v57 = vmul.f32 -1.442695, %v1358_v37 }
 0xbcf   :  { %v1360_v59 = vpop.f32.mrf.mxu1 }
 0xbd0   :  { %1914 = vpow2.f32 %v1534_v57 }
 0xbd1   :  { %v1364_v61 = vpop.f32.mrf.mxu1 }
 0xbd2   :  { %v1535_v0 = vmul.f32 -1.442695, %v1364_v61 }
 0xbd3   :  { %v1366_v14 = vpop.f32.mrf.mxu1 }
 0xbd4   :  { %1916 = vpow2.f32 %v1535_v0 }
 0xbdd   :  { %v1915_v47 = vpop.eup %1914 }
 0xbde   :  { %v1375_v6 = vadd.f32 1.0, %v1915_v47 }
 0xbe0   :  { %1918 = vrcp.f32 %v1375_v6 }
 0xbe1   :  { %v1917_v48 = vpop.eup %1916 }
 0xbe2   :  { %v1376_v42 = vadd.f32 1.0, %v1917_v48 }
 0xbe4   :  { %1920 = vrcp.f32 %v1376_v42 }
 0xbed   :  { %v1919_v13 = vpop.eup %1918 }
 0xbee   :  { %v1381_v50 = vmul.f32 %v1919_v13, %v1358_v37 }
 0xbf0   :  { %v1383_v7 = vmul.f32 %v1381_v50, %v1360_v59 }
 0xbf1   :  { %v1921_v11 = vpop.eup %1920 }
 0xbf2   :  { %v1382_v44 = vmul.f32 %v1921_v11, %v1364_v61  ;;  %1836 = vmatprep.mubr.f32.mxu0 %v1383_v7 }
 0xbf4   :  { %v1384_v2 = vmul.f32 %v1382_v44, %v1366_v14 }
 0xbf6   :  { %1837 = vmatmul.mubr.f32.vlgmr.msra.gmra.mxu0 %v1384_v2 }
 0xcb6   :  { %v1838_v12 = vpop.f32.mrf.mxu0 }
 0xcb7   :  { %v1461_v51 = vadd.f32 %v1838_v12, %v2353_v24 }
 0xcb8   :  { %v1451_v49 = vpop.f32.mrf.mxu0 }
 0xcb9   :  { %v1460_v19 = vadd.f32 %v1451_v49, %v2349_v18  ;;  %v1463_v52 = vmul.f32 %v1461_v51, %v1461_v51 }
 0xcbb   :  { %1466 = vadd.xlane.f32.xlu0 %v1463_v52  ;;  %v1462_v23 = vmul.f32 %v1460_v19, %v1460_v19 }
 0xcbd   :  { %1464 = vadd.xlane.f32.xlu1 %v1462_v23 }
 0xd44   :  { %v1467_v54 = vpop.xlane.xlu0 %1466 }
 0xd45   :  { %v1469_v55 = vmul.f32 0.03125, %v1467_v54 }
 0xd46   :  { %v1465_v58 = vpop.xlane.xlu1 %1464 }
 0xd47   :  { %v1471_v62 = vadd.f32 1e-05, %v1469_v55  ;;  %v1468_v1 = vmul.f32 0.03125, %v1465_v58 }
 0xd49   :  { %1922 = vrsqrt.f32 %v1471_v62  ;;  %v1470_v3 = vadd.f32 1e-05, %v1468_v1 }
 0xd4b   :  { %1924 = vrsqrt.f32 %v1470_v3 }
 0xd56   :  { %v1923_v5 = vpop.eup %1922 }
 0xd57   :  { %v1475_v8 = vmul.f32 %v1923_v5, %v1461_v51 }
 0xd58   :  { %v1925_v10 = vpop.eup %1924 }
 0xd59   :  { %v1481_v60 = vmul.f32 %v1479_v4, %v1475_v8  ;;  %v1474_v15 = vmul.f32 %v1925_v10, %v1460_v19 }
 0xd5b   :  { %1483 = vst [vmem:[%s2399_s8 + $0x8] sm:$0xff] %v1481_v60  ;;  %v1480_v18 = vmul.f32 %v1479_v4, %v1474_v15 }
 0xd5d   :  { %1482 = vst [vmem:[%s2399_s8] sm:$0xff] %v1480_v18 }

</bundles_post_ra>
